<compile_context>
chip_gen: v7x
topology: tpu7x:2x2x1
jax: 0.10.0
libtpu: 0.0.40
codegen_flags: <defaults>
</compile_context>

<pallas_src>
import math

import jax
import jax.numpy as jnp
from jax.experimental import pallas as pl
from jax.experimental.pallas import tpu as pltpu

LANE = 128
SUBLANE = 8


def _round_up(x, m):
    return (x + m - 1) // m * m


def _cdiv(a, b):
    return (a + b - 1) // b


def _choose_tile_hw(n_batch, hw, *, target=2048, min_grid=8):
    """Spatial (lane) tile: a multiple of 128, <= padded HW, large enough to
    amortize per-step overhead, small enough that the grid has >= ~min_grid
    steps (v7x megacore pipelining / load balance)."""
    hw_lanes = _round_up(hw, LANE)
    tile = _round_up(min(target, hw_lanes), LANE)
    while tile > LANE and n_batch * _cdiv(hw_lanes, tile) < min_grid:
        new_tile = _round_up(max(LANE, tile // 2), LANE)
        if new_tile >= tile:
            break
        tile = new_tile
    return tile


# ------------------------------ Pallas kernel -------------------------------

def _outconv_kernel(x_ref, w_ref, b_ref, o_ref):
    # x: (Cin, tile_hw) f32   w: (Cout, Cin) f32   b: (Cout, 1) f32
    # o: (Cout, tile_hw) f32
    y = jnp.dot(w_ref[...], x_ref[...], preferred_element_type=jnp.float32)
    o_ref[...] = jnp.tanh(y + b_ref[...]).astype(o_ref.dtype)


# --------------------------------- wrapper -----------------------------------

def out_conv_forward(params, x_nchw):
    """OutConv forward: Conv2d(Cin, Cout, kernel_size=1) + Tanh.  NCHW in/out."""
    N, Cin, H, W = x_nchw.shape
    w, b = params["w"], params["b"]                      # (Cout, Cin), (Cout,)
    Cout = w.shape[0]
    HW = H * W

    tile_hw = _choose_tile_hw(N, HW)
    hw_pad = _round_up(HW, tile_hw)

    # (N, Cin, H, W) -> (N, Cin, HW): trailing-dim merge, no data movement.
    x3 = x_nchw.reshape(N, Cin, HW)
    if hw_pad != HW:
        x3 = jnp.pad(x3, ((0, 0), (0, 0), (0, hw_pad - HW)))
    b2 = b.reshape(Cout, 1)

    grid = (N, hw_pad // tile_hw)

    # Exact double-buffered VMEM footprint (+2x headroom), capped for v7x.
    x_tile = Cin * tile_hw * 4
    o_tile = _round_up(Cout, SUBLANE) * tile_hw * 4
    w_buf = _round_up(Cout, SUBLANE) * _round_up(Cin, LANE) * 4
    b_buf = _round_up(Cout, SUBLANE) * LANE * 4
    vmem_bytes = 2 * (x_tile + o_tile + w_buf + b_buf)
    vmem_limit = int(min(max(2 * vmem_bytes, 1 << 20), 32 << 20))

    out = pl.pallas_call(
        _outconv_kernel,
        out_shape=jax.ShapeDtypeStruct((N, Cout, hw_pad), x_nchw.dtype),
        grid=grid,
        in_specs=[
            pl.BlockSpec((None, Cin, tile_hw), lambda n, j: (n, 0, j)),  # x tile
            pl.BlockSpec((Cout, Cin), lambda n, j: (0, 0)),              # weight
            pl.BlockSpec((Cout, 1), lambda n, j: (0, 0)),                # bias
        ],
        out_specs=pl.BlockSpec((None, Cout, tile_hw), lambda n, j: (n, 0, j)),
        compiler_params=pltpu.CompilerParams(
            dimension_semantics=("parallel", "parallel"),
            vmem_limit_bytes=vmem_limit,
        ),
    )(x3, w, b2)

    if hw_pad != HW:
        out = out[:, :, :HW]
    return out.reshape(N, Cout, H, W)


def init_outconv_params(key, in_channels, out_channels):
    # Matches PyTorch Conv2d default init (uniform with bound 1/sqrt(fan_in)).
    kw, kb = jax.random.split(key)
    bound = 1.0 / math.sqrt(in_channels)
    w = jax.random.uniform(kw, (out_channels, in_channels), jnp.float32, -bound, bound)
    b = jax.random.uniform(kb, (out_channels,), jnp.float32, -bound, bound)
    return {"w": w, "b": b}


def _reference(params, x_nchw):
    w, b = params["w"], params["b"]
    y = jnp.einsum("nchw,oc->nohw", x_nchw.astype(jnp.float32),
                   w.astype(jnp.float32),
                   preferred_element_type=jnp.float32)
    return jnp.tanh(y + b[None, :, None, None])


# ----------------------------------- main ------------------------------------

if __name__ == "__main__":
    key = jax.random.PRNGKey(0)
    k_x, k_p, k_x2 = jax.random.split(key, 3)

    # Shapes implied by the UNet context: OutConv(64 -> 3).
    N, Cin, H, W = 4, 64, 16, 16          # HW = 256 -> tile 128, grid (4, 2) = 8 steps
    Cout = 3
    x = jax.random.normal(k_x, (N, Cin, H, W), dtype=jnp.float32)
    params = init_outconv_params(k_p, Cin, Cout)

    fwd = jax.jit(out_conv_forward)
    out = fwd(params, x)
    jax.block_until_ready(out)

    assert out.shape == (N, Cout, H, W), out.shape
    assert bool(jnp.all(jnp.isfinite(out)))
    ref = _reference(params, x)
    assert bool(jnp.allclose(out, ref, atol=2e-3, rtol=0)), \
        float(jnp.max(jnp.abs(out - ref)))

    # Ragged spatial size: exercises HW-padding (35 -> 128) and the lane-slice epilogue.
    x_odd = jax.random.normal(k_x2, (1, Cin, 5, 7), dtype=jnp.float32)
    out_odd = jax.block_until_ready(fwd(params, x_odd))
    ref_odd = _reference(params, x_odd)
    assert out_odd.shape == (1, Cout, 5, 7), out_odd.shape
    assert bool(jnp.allclose(out_odd, ref_odd, atol=2e-3, rtol=0))

    print("KERNEL_OK")
</pallas_src>

<mosaic_0001>
module attributes {stable_mosaic.version = 11 : i64} {
  func.func @_outconv_kernel(%arg0: i32, %arg1: i32, %arg2: memref<1x64x128xf32, #tpu.memory_space<vmem>>, %arg3: memref<3x64xf32, #tpu.memory_space<vmem>>, %arg4: memref<3x1xf32, #tpu.memory_space<vmem>>, %arg5: memref<1x3x128xf32, #tpu.memory_space<vmem>>) attributes {dimension_semantics = [#tpu.dimension_semantics<parallel>, #tpu.dimension_semantics<parallel>], iteration_bounds = array<i64: 4, 2>, scalar_prefetch = 0 : i64, scratch_operands = 0 : i64, tpu.core_type = #tpu.core_type<tc>, window_params = [{transform_indices = @transform_0, window_bounds = array<i64: 1, 64, 128>}, {pipeline_mode = #tpu.pipeline_mode<synchronous>, transform_indices = @transform_1, window_bounds = array<i64: 3, 64>}, {pipeline_mode = #tpu.pipeline_mode<synchronous>, transform_indices = @transform_2, window_bounds = array<i64: 3, 1>}, {transform_indices = @transform_3, window_bounds = array<i64: 1, 3, 128>}]} {
    %c0 = arith.constant 0 : index
    %c0_0 = arith.constant 0 : index
    %0 = vector.load %arg3[%c0, %c0_0] : memref<3x64xf32, #tpu.memory_space<vmem>>, vector<3x64xf32>
    %c0_1 = arith.constant 0 : index
    %c0_2 = arith.constant 0 : index
    %c0_3 = arith.constant 0 : index
    %1 = vector.load %arg2[%c0_1, %c0_2, %c0_3] : memref<1x64x128xf32, #tpu.memory_space<vmem>>, vector<1x64x128xf32>
    %2 = vector.shape_cast %1 : vector<1x64x128xf32> to vector<64x128xf32>
    %cst = arith.constant dense<0.000000e+00> : vector<3x128xf32>
    %3 = tpu.matmul %0, %2, %cst {dimension_numbers = #tpu.dot_dimension_numbers<[1], [0], [0], [1], [0, 0, 1, 1], [], []>} : vector<3x64xf32>, vector<64x128xf32>, vector<3x128xf32> -> vector<3x128xf32>
    %c0_4 = arith.constant 0 : index
    %c0_5 = arith.constant 0 : index
    %4 = vector.load %arg4[%c0_4, %c0_5] : memref<3x1xf32, #tpu.memory_space<vmem>>, vector<3x1xf32>
    %5 = vector.broadcast %4 : vector<3x1xf32> to vector<3x128xf32>
    %6 = arith.addf %3, %5 : vector<3x128xf32>
    %7 = math.tanh %6 : vector<3x128xf32>
    %c0_6 = arith.constant 0 : index
    %c0_7 = arith.constant 0 : index
    %c0_8 = arith.constant 0 : index
    %8 = vector.load %arg5[%c0_6, %c0_7, %c0_8] : memref<1x3x128xf32, #tpu.memory_space<vmem>>, vector<1x3x128xf32>
    %9 = vector.shape_cast %8 : vector<1x3x128xf32> to vector<3x128xf32>
    %10 = vector.shape_cast %7 : vector<3x128xf32> to vector<1x3x128xf32>
    tpu.vector_store %arg5[%c0_6, %c0_7, %c0_8], %10 {strides = array<i32>} : memref<1x3x128xf32, #tpu.memory_space<vmem>>, vector<1x3x128xf32>,
    return
  }
  func.func @transform_0(%arg0: i32, %arg1: i32) -> (i32, i32, i32) {
    %c0_i32 = arith.constant 0 : i32
    %c0_i32_0 = arith.constant 0 : i32
    return %arg0, %c0_i32, %arg1 : i32, i32, i32
  }
  func.func @transform_1(%arg0: i32, %arg1: i32) -> (i32, i32) {
    %c0_i32 = arith.constant 0 : i32
    %c0_i32_0 = arith.constant 0 : i32
    %c0_i32_1 = arith.constant 0 : i32
    return %c0_i32, %c0_i32_0 : i32, i32
  }
  func.func @transform_2(%arg0: i32, %arg1: i32) -> (i32, i32) {
    %c0_i32 = arith.constant 0 : i32
    %c0_i32_0 = arith.constant 0 : i32
    %c0_i32_1 = arith.constant 0 : i32
    return %c0_i32, %c0_i32_0 : i32, i32
  }
  func.func @transform_3(%arg0: i32, %arg1: i32) -> (i32, i32, i32) {
    %c0_i32 = arith.constant 0 : i32
    %c0_i32_0 = arith.constant 0 : i32
    return %arg0, %c0_i32, %arg1 : i32, i32, i32
  }
}

</mosaic_0001>

<bundles_post_ra>
// kernel: out_conv_forward.1
= control target key start
LH: loop header
LB: loop body
LE: loop exit
PB: predicated region body
PF: predicated region fallthrough
CT: control target
= control target key end

     0   :  { %s633_s12 = smov 0   ;;  %s635_s13 = smov 0   ;;  %s730_s0 = inlined_call_operand.vmem [shape: f32[4,64,256], index: 0, kind: input, shape index: {}]   ;;  %s731_s1 = inlined_call_operand.vmem [shape: f32[3,64], index: 1, kind: input, shape index: {}]   ;;  %s732_s2 = inlined_call_operand.vmem [shape: f32[3,1], index: 2, kind: input, shape index: {}]   ;;  %s733_s3 = inlined_call_operand.vmem [shape: f32[4,3,256], index: 3, kind: output, shape index: {}]  }
   0x1   :  { %s637_s14 = smov 0   ;;  %s639_s15 = smov 0  }
   0x2   :  { %s641_s16 = smov 0   ;;  %s643_s17 = smov 0  }
   0x3   :  { %s645_s18 = smov 0  }
   0x4 LB: > { %s22_s19 = sadd.s32 1, %s599_s16  ;;  %s25_s20 = sadd.s32 1, %s603_s17  ;;  %s607_s18 = sphi %s645_s18, %s13_s18   ;;  %s603_s17 = sphi %s643_s17, %s739_s17   ;;  %s599_s16 = sphi %s641_s16, %s738_s16   ;;  %s595_s15 = sphi %s639_s15, %s737_s15   ;;  %s591_s14 = sphi %s637_s14, %s736_s14   ;;  %s587_s13 = sphi %s635_s13, %s735_s13   ;;  %s583_s12 = sphi %s633_s12, %s734_s12  }
   0x5   : > { %p23_p0 = scmp.ge.s32.totalorder %s22_s19, 2  ;;  %p41_p1 = scmp.ne.s32.totalorder %s587_s13, %s583_s12 }
   0x6   : > { %p42_p2 = scmp.eq.s32.totalorder %s607_s18, 0  ;;  %s34_s24 = sadd.s32 1, %s587_s13 }
   0x7   : > { %s741_s19 = smov (%p23_p0, %s22_s19), 0  ;;  %s743_s20 = smov (!%p23_p0, %s25_s20), %s603_s17 }
   0x8   : > { %p43_p3 = por %p42_p2, %p41_p1  ;;  %p27_p4 = scmp.ge.s32.totalorder %s743_s20, 4 }
   0x9   : > { %s30_s21 = ssub.s32 %s599_s16, %s741_s19  ;;  %p439_p6 = scmp.ge.s32.totalorder %s607_s18, 8 }
   0xa   : > { %s745_s20 = smov (%p27_p4, %s743_s20), 0 }
   0xb   : > { %s29_s22 = ssub.s32 %s603_s17, %s745_s20  ;;  %143 = sbr.rel (%p439_p6) target bundleno = 28 (0x1c), region = 24 }
   0xc   : > { %s31_s23 = sor.u32 %s30_s21, %s29_s22 }
   0xd   : > { %p32_p5 = scmp.eq.s32.totalorder %s31_s23, 0 }
   0xf   : > { %s684_s25 = scalar_select %p32_p5, %s587_s13, %s34_s24  }
  0x12   : > { %146 = sbr.rel (!%p43_p3) target bundleno = 28 (0x1c), region = 28  ;;  %s148_s26 = sand.u32 (%p43_p3), 1, %s587_s13  }
  0x13   : > { %s441_s27 = sshll.u32 (%p43_p3), %s603_s17, 4  ;;  %s440_s28 = sshll.u32 (%p43_p3), %s148_s26, 6 }
  0x14   : > { %s152_s29 = sadd.s32 (%p43_p3), %s599_s16, %s441_s27  ;;  %s150_s7 = scalar_lea.vmem (%p43_p3), [#allocation2], %s440_s28 }
  0x15   : > { %s442_s30 = sshll.u32 (%p43_p3), %s152_s29, 3 }
  0x16   : > { %s154_s6 = scalar_lea.vmem (%p43_p3), %s730_s0, %s442_s30 }
  0x17   : > { %v196_v0 = vld [vmem:[%s154_s6] sm:$0xff] (%p43_p3)  ;;  %v198_v1 = vld [vmem:[%s154_s6 + $0x10] sm:$0xff] (%p43_p3) }
  0x18   : > { %v200_v2 = vld [vmem:[%s154_s6 + $0x20] sm:$0xff] (%p43_p3)  ;;  %197 = vst [vmem:[%s150_s7] sm:$0xff] (%p43_p3), %v196_v0  ;;  %199 = vst [vmem:[%s150_s7 + $0x8] sm:$0xff] (%p43_p3), %v198_v1  ;;  %v202_v3 = vld [vmem:[%s154_s6 + $0x30] sm:$0xff] (%p43_p3) }
  0x19   : > { %201 = vst [vmem:[%s150_s7 + $0x10] sm:$0xff] %v200_v2  ;;  %v204_v4 = vld [vmem:[%s154_s6 + $0x40] sm:$0xff]  ;;  %v206_v5 = vld [vmem:[%s154_s6 + $0x50] sm:$0xff]  ;;  %203 = vst [vmem:[%s150_s7 + $0x18] sm:$0xff] %v202_v3 }
  0x1a   : > { %205 = vst [vmem:[%s150_s7 + $0x20] sm:$0xff] %v204_v4  ;;  %207 = vst [vmem:[%s150_s7 + $0x28] sm:$0xff] %v206_v5  ;;  %v208_v6 = vld [vmem:[%s154_s6 + $0x60] sm:$0xff]  ;;  %v210_v7 = vld [vmem:[%s154_s6 + $0x70] sm:$0xff] }
  0x1b   : > { %209 = vst [vmem:[%s150_s7 + $0x30] sm:$0xff] %v208_v6  ;;  %211 = vst [vmem:[%s150_s7 + $0x38] sm:$0xff] %v210_v7 }
  0x1c PF: > { %p443_p7 = scmp.ge.s32.totalorder %s607_s18, 1  ;;  %p216_p8 = scmp.lt.s32.totalorder %s607_s18, 9 }
  0x1e   : > { %p217_p9 = pnand %p443_p7, %p216_p8 }
  0x1f   : > { %s223_s8 = sand.u32 (!%p217_p9), 1, %s583_s12   ;;  %v609_v8 = vmov (!%p217_p9), 0.0|0.0   ;;  %vm610_vm0 = vmmov (!%p217_p9), 0   ;;  %v611_v9 = vmov (!%p217_p9), 0.0   ;;  %v266_v10 = vld [vmem:[%s732_s2] sm:$0x7] (!%p217_p9) }
  0x20   : > { %220 = sbr.rel (%p217_p9) target bundleno = 278 (0x116), region = 66  ;;  %478 = vmatprep.subr.bf16.mxu0 (!%p217_p9), %v609_v8  ;;  %s444_s9 = sshll.u32 (!%p217_p9), %s223_s8, 6  ;;  %475 = vmatprep.mubr.msk.f32.mxu0 (!%p217_p9), %vm610_vm0, %v611_v9  ;;  %v612_v11 = vmov (!%p217_p9), 0   ;;  %v257_v24 = vld [vmem:[%s731_s1] sm:$0x7] (!%p217_p9)  ;;  %vm272_vm1 = vcmask (!%p217_p9), 523264  }
  0x21   : > { %550 = vset.pattern.permute.xlu0 (!%p217_p9), %v612_v11  ;;  %s225_s21 = scalar_lea.vmem (!%p217_p9), [#allocation2], %s444_s9  ;;  %p249_p10 = scmp.lt.s32.totalorder (!%p217_p9), %s595_s15, 3 }
  0x22   : > { %v258_v12 = vld [vmem:[%s225_s21] sm:$0xff] (!%p217_p9)  ;;  %v259_v13 = vld [vmem:[%s225_s21 + $0x8] sm:$0xff] (!%p217_p9)  ;;  %v260_v14 = vld [vmem:[%s225_s21 + $0x10] sm:$0xff] (!%p217_p9)  ;;  %269 = vperm.xlu0 (!%p217_p9), %550, %v266_v10   ;;  %p251_p11 = scmp.lt.s32.totalorder (!%p217_p9), %s591_s14, 1 }
  0x23   : > { %v479_v15 = vpack.c.bf16 (!%p217_p9), %v259_v13, %v258_v12  ;;  %v261_v16 = vld [vmem:[%s225_s21 + $0x18] sm:$0xff] (!%p217_p9)  ;;  %v262_v18 = vld [vmem:[%s225_s21 + $0x20] sm:$0xff] (!%p217_p9)  ;;  %v263_v19 = vld [vmem:[%s225_s21 + $0x28] sm:$0xff] (!%p217_p9) }
  0x24   : > { %v482_v17 = vpack.c.bf16 (!%p217_p9), %v261_v16, %v260_v14  ;;  %v485_v20 = vpack.c.bf16 (!%p217_p9), %v263_v19, %v262_v18  ;;  %v264_v21 = vld [vmem:[%s225_s21 + $0x30] sm:$0xff] (!%p217_p9)  ;;  %v265_v22 = vld [vmem:[%s225_s21 + $0x38] sm:$0xff] (!%p217_p9) }
  0x25   : > { %480 = vmatpush3.bf16.msra.mxu0 (!%p217_p9), %v479_v15  ;;  %v488_v23 = vpack.c.bf16 (!%p217_p9), %v265_v22, %v264_v21 }
  0x26   : > { %481 = vmatprep.subr.bf16.mxu0 (!%p217_p9), %v609_v8 }
  0x27   : > { %s747_s15 = smov (!%p249_p10, %s595_s15), 3  ;;  %s749_s14 = smov (!%p251_p11, %s591_s14), 1 }
  0x28   : > { %s445_s23 = sshll.u32 %s747_s15, 1 }
  0x29   : > { %483 = vmatpush3.bf16.msra.mxu0 %v482_v17  ;;  %s254_s24 = sadd.s32 %s445_s23, %s749_s14 }
  0x2a   : > { %484 = vmatprep.subr.bf16.mxu0 %v609_v8  ;;  %s446_s26 = sshll.u32 %s254_s24, 2 }
  0x2b   : > { %s256_s29 = scalar_lea.vmem %s733_s3, %s446_s26 }
  0x2d   : > { %486 = vmatpush3.bf16.msra.mxu0 %v485_v20 }
  0x2e   : > { %487 = vmatprep.subr.bf16.mxu0 %v609_v8 }
  0x31   : > { %489 = vmatpush3.bf16.msra.mxu0 %v488_v23 }
  0x34   : > { %476 = vmatmul.mubr.msk.f32.vlgmr.msra.gmra.mrb[0].mxu0 %vm272_vm1, %v257_v24 }
  0xa1   : > { %v270_v25 = vpop.permute.xlu0 %269 }
 0x107   : > { %v342_v26 = vpop.f32.mrb[0].mxu0 }
 0x108   : > { %v343_v27 = vadd.f32 %v342_v26, %v270_v25  ;;  %v477_v28 = vpop.f32.mrb[1].mxu0 }
 0x10a   : > { %551 = vtanh.f32 %v343_v27 }
 0x114   : > { %v552_v29 = vpop.eup %551 }
 0x115   : > { %347 = vst [vmem:[%s256_s29] sm:$0x7] %v552_v29 }
 0x116 PF: > { %s13_s18 = sadd.s32 1, %s607_s18   ;;  %s734_s12 = smov %s587_s13 }
 0x117   : > { %p10_p12 = scmp.ge.s32.totalorder %s13_s18, 10   ;;  %s735_s13 = smov %s684_s25 }
 0x118   : > { %s736_s14 = smov %s599_s16  ;;  %s737_s15 = smov %s603_s17 }
 0x119   : > { %s738_s16 = smov %s741_s19  ;;  %s739_s17 = smov %s745_s20 }
 0x11a   :  { %12 = sbr.rel (!%p10_p12) target bundleno = 4 (0x4), region = 105 }

</bundles_post_ra>
